<compile_context>
chip_gen: v7x
topology: tpu7x:2x2x1
jax: 0.10.0
libtpu: 0.0.40
codegen_flags: <defaults>
</compile_context>

<pallas_src>
import functools

import jax
import jax.numpy as jnp
import numpy as np
from jax import lax
from jax.experimental import pallas as pl
from jax.experimental.pallas import tpu as pltpu


# --------------------------------------------------------------------------- #
# tiling helpers
# --------------------------------------------------------------------------- #
def _round_up(x, m):
    return ((x + m - 1) // m) * m


def _pick_row_tile(n_rows, max_rows):
    """Full rows if they fit, else the largest multiple-of-8 divisor <= max_rows."""
    if n_rows <= max_rows:
        return n_rows
    best = None
    t = 8
    while t <= max_rows:
        if n_rows % t == 0:
            best = t
        t += 8
    return best if best is not None else n_rows


# --------------------------------------------------------------------------- #
# kernel: one (P, row-tile, column-tile) step of the streaming negative LSE
# --------------------------------------------------------------------------- #
def _nce_stream_kernel(start_ref, src_ref, trg_ref,      # inputs
                       lse_ref, rr_ref,                  # outputs (per-row stats)
                       m_scr, s_scr, rr_scr,             # scratch
                       *, tclip, n_locs, n_valid, n_cols_total, inv_sqrt_d):
    j = pl.program_id(2)
    n_j = pl.num_programs(2)
    tile_n = trg_ref.shape[1]

    # ---- init running accumulators at the first column tile of this (p, i) ----
    @pl.when(j == 0)
    def _init():
        m_scr[...] = jnp.full(m_scr.shape, -1e30, jnp.float32)
        s_scr[...] = jnp.zeros(s_scr.shape, jnp.float32)
        rr_scr[...] = jnp.zeros(rr_scr.shape, jnp.float32)

    # main matmul: bf16 MXU, f32 accumulation
    raw = jnp.dot(src_ref[...], trg_ref[...],
                  preferred_element_type=jnp.float32) * inv_sqrt_d
    # zero-padded columns have raw == 0 exactly -> no effect on rr
    rr_scr[...] += jnp.sum(raw * raw, axis=1, keepdims=True)
    raw_c = tclip * jnp.tanh(raw * (1.0 / tclip))        # soft clip (EUP)

    # ---- positive / padded column mask: pure VPU compares, no mask matmul ----
    col0 = j * tile_n
    g = col0 + lax.broadcasted_iota(jnp.int32, (1, tile_n), 1)       # (1, TN)
    start = start_ref[...]                                           # (TM, 1) int32
    masked = jnp.logical_and(g >= start, g < start + n_locs)         # (TM, TN)
    if n_cols_total > n_valid:   # static: only when the wrapper zero-padded B*L
        masked = jnp.logical_or(masked, g >= n_valid)

    # Pin masked (positive / padded) scores to -1e9: exp underflows to exactly 0,
    # so they are excluded from the negative sum-exp exactly like the reference's
    # mask_neg, and (since real negatives are strictly > -tclip) they never win
    # the running max.  No second select in the LSE needed.
    neg = jnp.where(masked, -1e9, raw_c)

    # ---- streaming (online) log-sum-exp over the negatives ----
    m_old = m_scr[...]
    m_new = jnp.maximum(m_old, jnp.max(neg, axis=1, keepdims=True))
    s_scr[...] = (jnp.exp(m_old - m_new) * s_scr[...]
                  + jnp.sum(jnp.exp(neg - m_new), axis=1, keepdims=True))
    m_scr[...] = m_new

    # ---- finalize on the last column tile of this row tile ----
    @pl.when(j == n_j - 1)
    def _fin():
        lse_ref[...] = m_scr[...] + jnp.log(s_scr[...])   # log sum_neg exp(raw_c)
        rr_ref[...] = rr_scr[...]


# --------------------------------------------------------------------------- #
# pallas wrapper: batched (P, M, D) x (P, D, B*L) streaming negative-LSE
# --------------------------------------------------------------------------- #
def _nce_lse_rr_pallas(src, trg, pos_start, n_locs, *, tclip=20.0,
                       max_cols=1024, max_rows=1024,
                       vmem_limit_bytes=40 * 1024 * 1024,
                       mm_dtype=jnp.bfloat16):
    """src: (P, M, D); trg: (P, D, B*L); pos_start: (P, M) int32 = pos_batch*n_locs.

    Returns (lse, rr), both (P, M) f32:
      lse[p, m] = log sum over NEGATIVE columns of exp(tanh_clip(raw))
      rr [p, m] = sum over all columns of raw^2
    """
    p, m_rows, d = src.shape
    assert trg.shape[0] == p and trg.shape[1] == d and pos_start.shape == (p, m_rows)
    bl = trg.shape[2]

    tile_n = min(_round_up(bl, 128), _round_up(max(max_cols, 128), 128))
    bl_pad = _round_up(bl, tile_n)
    if bl_pad != bl:
        trg = jnp.pad(trg, ((0, 0), (0, 0), (0, bl_pad - bl)))
    tile_m = _pick_row_tile(m_rows, max_rows)
    grid = (p, m_rows // tile_m, bl_pad // tile_n)

    kernel = functools.partial(
        _nce_stream_kernel, tclip=float(tclip), n_locs=int(n_locs),
        n_valid=int(bl), n_cols_total=int(bl_pad),
        inv_sqrt_d=float(1.0 / np.sqrt(d)))

    grid_spec = pltpu.PrefetchScalarGridSpec(
        num_scalar_prefetch=0,
        grid=grid,
        in_specs=[
            pl.BlockSpec((None, tile_m, 1), lambda b, i, j: (b, i, 0)),   # pos_start
            pl.BlockSpec((None, tile_m, d), lambda b, i, j: (b, i, 0)),   # src (resident)
            pl.BlockSpec((None, d, tile_n), lambda b, i, j: (b, 0, j)),   # trg (streamed)
        ],
        out_specs=(
            pl.BlockSpec((None, tile_m, 1), lambda b, i, j: (b, i, 0)),   # lse
            pl.BlockSpec((None, tile_m, 1), lambda b, i, j: (b, i, 0)),   # rr
        ),
        scratch_shapes=[
            pltpu.VMEM((tile_m, 1), jnp.float32),   # running max
            pltpu.VMEM((tile_m, 1), jnp.float32),   # running sum-exp
            pltpu.VMEM((tile_m, 1), jnp.float32),   # sum(raw^2)
        ],
    )

    lse, rr = pl.pallas_call(
        kernel,
        out_shape=(jax.ShapeDtypeStruct((p, m_rows, 1), jnp.float32),
                   jax.ShapeDtypeStruct((p, m_rows, 1), jnp.float32)),
        grid_spec=grid_spec,
        compiler_params=pltpu.CompilerParams(
            dimension_semantics=("parallel", "parallel", "arbitrary"),
            vmem_limit_bytes=vmem_limit_bytes,
        ),
    )(pos_start.reshape(p, m_rows, 1).astype(jnp.int32),
      src.astype(mm_dtype), trg.astype(mm_dtype))

    return lse[..., 0], rr[..., 0]


# --------------------------------------------------------------------------- #
# wrapper-side positive scores (tiny gathered einsum; factor n_batch less work)
# --------------------------------------------------------------------------- #
def _positive_scores(src, trg, pos_b, n_locs, *, tclip, mm_dtype=jnp.bfloat16):
    p, m_rows, d = src.shape
    bl = trg.shape[2]
    n_b = bl // n_locs
    inv_sqrt_d = 1.0 / np.sqrt(d)
    trg_r = trg.reshape(p, d, n_b, n_locs)

    def one(s, t, pb):
        t_pos = jnp.take(t, pb, axis=1)                       # (D, M, L)
        raw = jnp.einsum('md,dml->ml', s.astype(mm_dtype), t_pos.astype(mm_dtype),
                         preferred_element_type=jnp.float32)
        return raw * inv_sqrt_d

    pos_raw = jax.vmap(one)(src, trg_r, pos_b)                # (P, M, L)
    return tclip * jnp.tanh(pos_raw * (1.0 / tclip))


def _nce_scores_batched(src, trg, mask_rows, *, tclip=20.0, max_cols=1024, max_rows=1024):
    """src: (P, M, D); trg: (P, D, B*L); mask_rows: (P, M, B) binary single-positive.

    Returns nce (P, M, L), pos (P, M, L), rr (P, M)."""
    p, m_rows, d = src.shape
    n_b = mask_rows.shape[2]
    bl = trg.shape[2]
    assert bl % n_b == 0
    n_locs = bl // n_b

    # TODO(synk): the argmax fast path assumes a binary mask with exactly one
    # positive per row (the identity-style mask the module is used with);
    # multi-positive rows would need the full mask-matmul path.
    pos_b = jnp.argmax(mask_rows, axis=2).astype(jnp.int32)          # (P, M)
    pos_start = pos_b * n_locs

    lse, rr = _nce_lse_rr_pallas(src, trg, pos_start, n_locs, tclip=tclip,
                                 max_cols=max_cols, max_rows=max_rows)
    pos = _positive_scores(src, trg, pos_b, n_locs, tclip=tclip)
    nce = pos - jnp.logaddexp(pos, lse[..., None])
    return nce, pos, rr


# --------------------------------------------------------------------------- #
# module-level API
# --------------------------------------------------------------------------- #
def nce_model_scores(r_src, r_trg, mask_mat, *, tclip=20.0, max_cols=1024, max_rows=1024):
    """Pallas equivalent of NCE_MI_MULTI._model_scores (+ the -mean(nce) loss)."""
    nce, pos, rr = _nce_scores_batched(r_src[None], r_trg[None], mask_mat[None],
                                       tclip=tclip, max_cols=max_cols, max_rows=max_rows)
    nce, pos, rr = nce[0], pos[0], rr[0]
    m_rows = r_src.shape[0]
    bl = r_trg.shape[1]
    loss = -jnp.mean(nce)
    lgt = 0.05 * jnp.sum(rr) / (m_rows * bl)
    return nce, pos, loss, lgt


def nce_mi_multi_forward(r1_src_1, r5_src_1, r1_src_2, r5_src_2,
                         r5_trg_1, r7_trg_1, r5_trg_2, r7_trg_2,
                         mask_mat, mode, tclip=20.0):
    assert mode in ('train', 'viz')
    if mode == 'viz':
        nce, pos, _, _ = nce_model_scores(r1_src_1, r7_trg_2[0], mask_mat, tclip=tclip)
        return nce, pos

    bg = r1_src_1.shape[0]
    mask2 = jnp.concatenate([mask_mat, mask_mat], axis=0)

    # Call A: P=2 batch; each problem fuses two sources sharing one r5 target
    # (each r5 target is streamed from HBM exactly once; P axis feeds megacore).
    srcA = jnp.stack([jnp.concatenate([r1_src_1, r5_src_1], axis=0),
                      jnp.concatenate([r1_src_2, r5_src_2], axis=0)], axis=0)
    trgA = jnp.stack([r5_trg_2[0], r5_trg_1[0]], axis=0)
    maskA = jnp.stack([mask2, mask2], axis=0)
    nceA, _, rrA = _nce_scores_batched(srcA, trgA, maskA, tclip=tclip)
    bl5 = trgA.shape[2]
    l151 = -jnp.mean(nceA[0, :bg]); l551 = -jnp.mean(nceA[0, bg:])
    l152 = -jnp.mean(nceA[1, :bg]); l552 = -jnp.mean(nceA[1, bg:])
    g151 = 0.05 * jnp.sum(rrA[0, :bg]) / (bg * bl5)
    g551 = 0.05 * jnp.sum(rrA[0, bg:]) / (bg * bl5)
    g152 = 0.05 * jnp.sum(rrA[1, :bg]) / (bg * bl5)
    g552 = 0.05 * jnp.sum(rrA[1, bg:]) / (bg * bl5)

    # Call B: P=2 batch of the two 1->7 problems (different src AND trg).
    srcB = jnp.stack([r1_src_1, r1_src_2], axis=0)
    trgB = jnp.stack([r7_trg_2[0], r7_trg_1[0]], axis=0)
    maskB = jnp.stack([mask_mat, mask_mat], axis=0)
    nceB, _, rrB = _nce_scores_batched(srcB, trgB, maskB, tclip=tclip)
    bl7 = trgB.shape[2]
    l171 = -jnp.mean(nceB[0]); l172 = -jnp.mean(nceB[1])
    g171 = 0.05 * jnp.sum(rrB[0]) / (bg * bl7)
    g172 = 0.05 * jnp.sum(rrB[1]) / (bg * bl7)

    loss_1t5 = 0.5 * (l151 + l152)
    loss_1t7 = 0.5 * (l171 + l172)
    loss_5t5 = 0.5 * (l551 + l552)
    lgt_reg = 0.5 * (g151 + g152 + g171 + g172 + g551 + g552)

    # degenerate-mask branch (reference uses an eager .item() check; traced here)
    mmf = mask_mat.astype(jnp.float32)
    mm = jnp.mean(mmf)
    empty = jnp.sum(mmf) < 0.1
    pick = lambda x: jnp.where(empty, mm, x)
    return pick(loss_1t5), pick(loss_1t7), pick(loss_5t5), pick(lgt_reg)


# --------------------------------------------------------------------------- #
# pure-JAX reference (mirrors the PyTorch module)
# --------------------------------------------------------------------------- #
def _model_scores_ref(r_src, r_trg, mask_mat, tclip, mm_dtype=jnp.bfloat16):
    bg, d = r_src.shape
    b = mask_mat.shape[1]
    l = r_trg.shape[1] // b
    raw = jnp.dot(r_src.astype(mm_dtype), r_trg.astype(mm_dtype),
                  preferred_element_type=jnp.float32)
    raw = raw.reshape(bg, b, l) * (1.0 / np.sqrt(d))
    lgt = 0.05 * jnp.mean(raw ** 2)
    raw_c = tclip * jnp.tanh(raw * (1.0 / tclip))
    mask_pos = jnp.broadcast_to(mask_mat.astype(jnp.float32)[:, :, None], (bg, b, l))
    mask_neg = 1.0 - mask_pos
    pos = (mask_pos * raw_c).sum(1)
    neg = (mask_neg * raw_c - tclip * mask_pos).reshape(bg, -1)
    mask_neg_f = mask_neg.reshape(bg, -1)
    neg_max = neg.max(1, keepdims=True)
    neg_sumexp = (mask_neg_f * jnp.exp(neg - neg_max)).sum(1, keepdims=True)
    nce = (pos - neg_max) - jnp.log(jnp.exp(pos - neg_max) + neg_sumexp)
    return nce, pos, lgt


# --------------------------------------------------------------------------- #
# demo / self-check
# --------------------------------------------------------------------------- #
if __name__ == "__main__":
    key = jax.random.PRNGKey(0)
    n_batch, n_rkhs, n_locs5, n_locs7 = 16, 128, 16, 32
    ks = jax.random.split(key, 8)
    r1_src_1 = jax.random.normal(ks[0], (n_batch, n_rkhs), jnp.float32)
    r5_src_1 = jax.random.normal(ks[1], (n_batch, n_rkhs), jnp.float32)
    r1_src_2 = jax.random.normal(ks[2], (n_batch, n_rkhs), jnp.float32)
    r5_src_2 = jax.random.normal(ks[3], (n_batch, n_rkhs), jnp.float32)
    r5_trg_1 = jax.random.normal(ks[4], (1, n_rkhs, n_batch * n_locs5), jnp.float32)
    r5_trg_2 = jax.random.normal(ks[5], (1, n_rkhs, n_batch * n_locs5), jnp.float32)
    r7_trg_1 = jax.random.normal(ks[6], (1, n_rkhs, n_batch * n_locs7), jnp.float32)
    r7_trg_2 = jax.random.normal(ks[7], (1, n_rkhs, n_batch * n_locs7), jnp.float32)
    mask_mat = jnp.eye(n_batch, dtype=jnp.float32)

    # --- train-mode forward: 6 NCE losses in 2 batched/fused Pallas calls ---
    outs = jax.block_until_ready(
        nce_mi_multi_forward(r1_src_1, r5_src_1, r1_src_2, r5_src_2,
                             r5_trg_1, r7_trg_1, r5_trg_2, r7_trg_2,
                             mask_mat, 'train'))

    # --- viz-mode forward ---
    nce_viz, pos_viz = jax.block_until_ready(
        nce_mi_multi_forward(r1_src_1, r5_src_1, r1_src_2, r5_src_2,
                             r5_trg_1, r7_trg_1, r5_trg_2, r7_trg_2,
                             mask_mat, 'viz'))

    # --- correctness: multi-tile streaming path (2 row tiles x 2 column tiles) ---
    nce_k, pos_k, loss_k, lgt_k = jax.block_until_ready(
        nce_model_scores(r1_src_1, r5_trg_2[0], mask_mat, max_cols=128, max_rows=8))
    nce_r, pos_r, lgt_r = _model_scores_ref(r1_src_1, r5_trg_2[0], mask_mat, 20.0)
    np.testing.assert_allclose(np.asarray(nce_k), np.asarray(nce_r), rtol=5e-3, atol=5e-3)
    np.testing.assert_allclose(np.asarray(pos_k), np.asarray(pos_r), rtol=5e-3, atol=5e-3)
    np.testing.assert_allclose(float(loss_k), float(-nce_r.mean()), rtol=5e-3, atol=5e-3)
    np.testing.assert_allclose(float(lgt_k), float(lgt_r), rtol=5e-3, atol=5e-3)

    # --- correctness: zero-padded column path (B*L=512, tile_n=384 -> pad to 768) ---
    nce_p, pos_p, _, lgt_p = jax.block_until_ready(
        nce_model_scores(r1_src_1, r7_trg_2[0], mask_mat, max_cols=384, max_rows=8))
    nce_r7, pos_r7, lgt_r7 = _model_scores_ref(r1_src_1, r7_trg_2[0], mask_mat, 20.0)
    np.testing.assert_allclose(np.asarray(nce_p), np.asarray(nce_r7), rtol=5e-3, atol=5e-3)
    np.testing.assert_allclose(np.asarray(pos_p), np.asarray(pos_r7), rtol=5e-3, atol=5e-3)
    np.testing.assert_allclose(float(lgt_p), float(lgt_r7), rtol=5e-3, atol=5e-3)

    # --- correctness: viz output (single-tile path) ---
    np.testing.assert_allclose(np.asarray(nce_viz), np.asarray(nce_r7), rtol=5e-3, atol=5e-3)
    np.testing.assert_allclose(np.asarray(pos_viz), np.asarray(pos_r7), rtol=5e-3, atol=5e-3)

    # --- drift check vs a full-f32 reference (bf16 MXU matmul drift, loose tol) ---
    nce_f32, pos_f32, _ = _model_scores_ref(r1_src_1, r7_trg_2[0], mask_mat, 20.0,
                                            mm_dtype=jnp.float32)
    np.testing.assert_allclose(np.asarray(nce_viz), np.asarray(nce_f32), rtol=5e-2, atol=5e-2)
    np.testing.assert_allclose(np.asarray(pos_viz), np.asarray(pos_f32), rtol=5e-2, atol=5e-2)

    # --- correctness: batched/fused train-mode losses ---
    def ref_loss(src, trg):
        nce, _, lgt = _model_scores_ref(src, trg, mask_mat, 20.0)
        return -nce.mean(), lgt
    rl151, rg151 = ref_loss(r1_src_1, r5_trg_2[0])
    rl152, rg152 = ref_loss(r1_src_2, r5_trg_1[0])
    rl171, rg171 = ref_loss(r1_src_1, r7_trg_2[0])
    rl172, rg172 = ref_loss(r1_src_2, r7_trg_1[0])
    rl551, rg551 = ref_loss(r5_src_1, r5_trg_2[0])
    rl552, rg552 = ref_loss(r5_src_2, r5_trg_1[0])
    ref_outs = (0.5 * (rl151 + rl152), 0.5 * (rl171 + rl172), 0.5 * (rl551 + rl552),
                0.5 * (rg151 + rg152 + rg171 + rg172 + rg551 + rg552))
    for got, want in zip(outs, ref_outs):
        np.testing.assert_allclose(float(got), float(want), rtol=5e-3, atol=5e-3)

    assert all(np.isfinite(np.asarray(o)).all() for o in outs)
    assert np.isfinite(np.asarray(nce_viz)).all() and np.isfinite(np.asarray(pos_viz)).all()

    print("KERNEL_OK")
</pallas_src>

<mosaic_0001>
module attributes {stable_mosaic.version = 11 : i64} {
  func.func @_nce_stream_kernel(%arg0: i32, %arg1: i32, %arg2: i32, %arg3: memref<1x32x1xi32, #tpu.memory_space<vmem>>, %arg4: memref<1x32x128xbf16, #tpu.memory_space<vmem>>, %arg5: memref<1x128x256xbf16, #tpu.memory_space<vmem>>, %arg6: memref<1x32x1xf32, #tpu.memory_space<vmem>>, %arg7: memref<1x32x1xf32, #tpu.memory_space<vmem>>, %arg8: memref<32x1xf32, #tpu.memory_space<vmem>>, %arg9: memref<32x1xf32, #tpu.memory_space<vmem>>, %arg10: memref<32x1xf32, #tpu.memory_space<vmem>>) attributes {dimension_semantics = [#tpu.dimension_semantics<parallel>, #tpu.dimension_semantics<parallel>, #tpu.dimension_semantics<arbitrary>], iteration_bounds = array<i64: 2, 1, 1>, scalar_prefetch = 0 : i64, scratch_operands = 3 : i64, tpu.core_type = #tpu.core_type<tc>, window_params = [{transform_indices = @transform_0, window_bounds = array<i64: 1, 32, 1>}, {transform_indices = @transform_1, window_bounds = array<i64: 1, 32, 128>}, {transform_indices = @transform_2, window_bounds = array<i64: 1, 128, 256>}, {transform_indices = @transform_3, window_bounds = array<i64: 1, 32, 1>}, {transform_indices = @transform_4, window_bounds = array<i64: 1, 32, 1>}]} {
    %c0_i32 = arith.constant 0 : i32
    %0 = arith.cmpi eq, %arg2, %c0_i32 : i32
    %1 = arith.extui %0 : i1 to i32
    %c0_i32_0 = arith.constant 0 : i32
    %2 = arith.cmpi ne, %1, %c0_i32_0 : i32
    scf.if %2 {
      %cst_30 = arith.constant -1.000000e+30 : f32
      %57 = vector.broadcast %cst_30 : f32 to vector<32x1xf32>
      %c0_31 = arith.constant 0 : index
      %c0_32 = arith.constant 0 : index
      %58 = vector.load %arg8[%c0_31, %c0_32] : memref<32x1xf32, #tpu.memory_space<vmem>>, vector<32x1xf32>
      tpu.vector_store %arg8[%c0_31, %c0_32], %57 {strides = array<i32>} : memref<32x1xf32, #tpu.memory_space<vmem>>, vector<32x1xf32>,
      %cst_33 = arith.constant 0.000000e+00 : f32
      %59 = vector.broadcast %cst_33 : f32 to vector<32x1xf32>
      %c0_34 = arith.constant 0 : index
      %c0_35 = arith.constant 0 : index
      %60 = vector.load %arg9[%c0_34, %c0_35] : memref<32x1xf32, #tpu.memory_space<vmem>>, vector<32x1xf32>
      tpu.vector_store %arg9[%c0_34, %c0_35], %59 {strides = array<i32>} : memref<32x1xf32, #tpu.memory_space<vmem>>, vector<32x1xf32>,
      %cst_36 = arith.constant 0.000000e+00 : f32
      %61 = vector.broadcast %cst_36 : f32 to vector<32x1xf32>
      %c0_37 = arith.constant 0 : index
      %c0_38 = arith.constant 0 : index
      %62 = vector.load %arg10[%c0_37, %c0_38] : memref<32x1xf32, #tpu.memory_space<vmem>>, vector<32x1xf32>
      tpu.vector_store %arg10[%c0_37, %c0_38], %61 {strides = array<i32>} : memref<32x1xf32, #tpu.memory_space<vmem>>, vector<32x1xf32>,
    } else {
    }
    %c0 = arith.constant 0 : index
    %c0_1 = arith.constant 0 : index
    %c0_2 = arith.constant 0 : index
    %3 = vector.load %arg4[%c0, %c0_1, %c0_2] : memref<1x32x128xbf16, #tpu.memory_space<vmem>>, vector<1x32x128xbf16>
    %4 = vector.shape_cast %3 : vector<1x32x128xbf16> to vector<32x128xbf16>
    %c0_3 = arith.constant 0 : index
    %c0_4 = arith.constant 0 : index
    %c0_5 = arith.constant 0 : index
    %5 = vector.load %arg5[%c0_3, %c0_4, %c0_5] : memref<1x128x256xbf16, #tpu.memory_space<vmem>>, vector<1x128x256xbf16>
    %6 = vector.shape_cast %5 : vector<1x128x256xbf16> to vector<128x256xbf16>
    %cst = arith.constant dense<0.000000e+00> : vector<32x256xf32>
    %7 = tpu.matmul %4, %6, %cst {dimension_numbers = #tpu.dot_dimension_numbers<[1], [0], [0], [1], [0, 0, 1, 1], [], []>} : vector<32x128xbf16>, vector<128x256xbf16>, vector<32x256xf32> -> vector<32x256xf32>
    %cst_6 = arith.constant 0.0883883461 : f32
    %8 = vector.broadcast %cst_6 : f32 to vector<32x256xf32>
    %9 = arith.mulf %7, %8 : vector<32x256xf32>
    %c0_7 = arith.constant 0 : index
    %c0_8 = arith.constant 0 : index
    %10 = vector.load %arg10[%c0_7, %c0_8] : memref<32x1xf32, #tpu.memory_space<vmem>>, vector<32x1xf32>
    %11 = arith.mulf %9, %9 : vector<32x256xf32>
    %cst_9 = arith.constant dense<0.000000e+00> : vector<32xf32>
    %12 = vector.multi_reduction <add>, %11, %cst_9 [1] : vector<32x256xf32> to vector<32xf32>
    %13 = vector.shape_cast %12 : vector<32xf32> to vector<32x1xf32>
    %14 = arith.addf %10, %13 : vector<32x1xf32>
    %c0_10 = arith.constant 0 : index
    %c0_11 = arith.constant 0 : index
    %15 = vector.load %arg10[%c0_10, %c0_11] : memref<32x1xf32, #tpu.memory_space<vmem>>, vector<32x1xf32>
    tpu.vector_store %arg10[%c0_10, %c0_11], %14 {strides = array<i32>} : memref<32x1xf32, #tpu.memory_space<vmem>>, vector<32x1xf32>,
    %cst_12 = arith.constant 5.000000e-02 : f32
    %16 = vector.broadcast %cst_12 : f32 to vector<32x256xf32>
    %17 = arith.mulf %9, %16 : vector<32x256xf32>
    %18 = math.tanh %17 : vector<32x256xf32>
    %cst_13 = arith.constant 2.000000e+01 : f32
    %19 = vector.broadcast %cst_13 : f32 to vector<32x256xf32>
    %20 = arith.mulf %19, %18 : vector<32x256xf32>
    %c256_i32 = arith.constant 256 : i32
    %21 = arith.muli %arg2, %c256_i32 : i32
    %22 = tpu.iota {dimensions = array<i32: 1>} : vector<1x256xi32>
    %23 = vector.broadcast %21 : i32 to vector<1x256xi32>
    %24 = arith.addi %23, %22 : vector<1x256xi32>
    %c0_14 = arith.constant 0 : index
    %c0_15 = arith.constant 0 : index
    %c0_16 = arith.constant 0 : index
    %25 = vector.load %arg3[%c0_14, %c0_15, %c0_16] : memref<1x32x1xi32, #tpu.memory_space<vmem>>, vector<1x32x1xi32>
    %26 = vector.shape_cast %25 : vector<1x32x1xi32> to vector<32x1xi32>
    %27 = vector.broadcast %24 : vector<1x256xi32> to vector<32x256xi32>
    %28 = vector.broadcast %26 : vector<32x1xi32> to vector<32x256xi32>
    %29 = arith.cmpi sge, %27, %28 : vector<32x256xi32>
    %c16_i32 = arith.constant 16 : i32
    %30 = vector.broadcast %c16_i32 : i32 to vector<32x1xi32>
    %31 = arith.addi %26, %30 : vector<32x1xi32>
    %32 = vector.broadcast %24 : vector<1x256xi32> to vector<32x256xi32>
    %33 = vector.broadcast %31 : vector<32x1xi32> to vector<32x256xi32>
    %34 = arith.cmpi slt, %32, %33 : vector<32x256xi32>
    %35 = arith.andi %29, %34 : vector<32x256xi1>
    %cst_17 = arith.constant -1.000000e+09 : f32
    %36 = vector.broadcast %cst_17 : f32 to vector<32x256xf32>
    %37 = arith.select %35, %36, %20 : vector<32x256xi1>, vector<32x256xf32>
    %c0_18 = arith.constant 0 : index
    %c0_19 = arith.constant 0 : index
    %38 = vector.load %arg8[%c0_18, %c0_19] : memref<32x1xf32, #tpu.memory_space<vmem>>, vector<32x1xf32>
    %cst_20 = arith.constant dense<0xFF800000> : vector<32xf32>
    %39 = vector.multi_reduction <maximumf>, %37, %cst_20 [1] : vector<32x256xf32> to vector<32xf32>
    %40 = vector.shape_cast %39 : vector<32xf32> to vector<32x1xf32>
    %41 = arith.maximumf %38, %40 : vector<32x1xf32>
    %42 = arith.subf %38, %41 : vector<32x1xf32>
    %43 = math.exp %42 : vector<32x1xf32>
    %c0_21 = arith.constant 0 : index
    %c0_22 = arith.constant 0 : index
    %44 = vector.load %arg9[%c0_21, %c0_22] : memref<32x1xf32, #tpu.memory_space<vmem>>, vector<32x1xf32>
    %45 = arith.mulf %43, %44 : vector<32x1xf32>
    %46 = vector.broadcast %41 : vector<32x1xf32> to vector<32x256xf32>
    %47 = arith.subf %37, %46 : vector<32x256xf32>
    %48 = math.exp %47 : vector<32x256xf32>
    %cst_23 = arith.constant dense<0.000000e+00> : vector<32xf32>
    %49 = vector.multi_reduction <add>, %48, %cst_23 [1] : vector<32x256xf32> to vector<32xf32>
    %50 = vector.shape_cast %49 : vector<32xf32> to vector<32x1xf32>
    %51 = arith.addf %45, %50 : vector<32x1xf32>
    %c0_24 = arith.constant 0 : index
    %c0_25 = arith.constant 0 : index
    %52 = vector.load %arg9[%c0_24, %c0_25] : memref<32x1xf32, #tpu.memory_space<vmem>>, vector<32x1xf32>
    tpu.vector_store %arg9[%c0_24, %c0_25], %51 {strides = array<i32>} : memref<32x1xf32, #tpu.memory_space<vmem>>, vector<32x1xf32>,
    %c0_26 = arith.constant 0 : index
    %c0_27 = arith.constant 0 : index
    %53 = vector.load %arg8[%c0_26, %c0_27] : memref<32x1xf32, #tpu.memory_space<vmem>>, vector<32x1xf32>
    tpu.vector_store %arg8[%c0_26, %c0_27], %41 {strides = array<i32>} : memref<32x1xf32, #tpu.memory_space<vmem>>, vector<32x1xf32>,
    %c0_i32_28 = arith.constant 0 : i32
    %54 = arith.cmpi eq, %arg2, %c0_i32_28 : i32
    %55 = arith.extui %54 : i1 to i32
    %c0_i32_29 = arith.constant 0 : i32
    %56 = arith.cmpi ne, %55, %c0_i32_29 : i32
    scf.if %56 {
      %c0_30 = arith.constant 0 : index
      %c0_31 = arith.constant 0 : index
      %57 = vector.load %arg8[%c0_30, %c0_31] : memref<32x1xf32, #tpu.memory_space<vmem>>, vector<32x1xf32>
      %c0_32 = arith.constant 0 : index
      %c0_33 = arith.constant 0 : index
      %58 = vector.load %arg9[%c0_32, %c0_33] : memref<32x1xf32, #tpu.memory_space<vmem>>, vector<32x1xf32>
      %59 = math.log %58 : vector<32x1xf32>
      %60 = arith.addf %57, %59 : vector<32x1xf32>
      %c0_34 = arith.constant 0 : index
      %c0_35 = arith.constant 0 : index
      %c0_36 = arith.constant 0 : index
      %61 = vector.load %arg6[%c0_34, %c0_35, %c0_36] : memref<1x32x1xf32, #tpu.memory_space<vmem>>, vector<1x32x1xf32>
      %62 = vector.shape_cast %61 : vector<1x32x1xf32> to vector<32x1xf32>
      %63 = vector.shape_cast %60 : vector<32x1xf32> to vector<1x32x1xf32>
      tpu.vector_store %arg6[%c0_34, %c0_35, %c0_36], %63 {strides = array<i32>} : memref<1x32x1xf32, #tpu.memory_space<vmem>>, vector<1x32x1xf32>,
      %c0_37 = arith.constant 0 : index
      %c0_38 = arith.constant 0 : index
      %64 = vector.load %arg10[%c0_37, %c0_38] : memref<32x1xf32, #tpu.memory_space<vmem>>, vector<32x1xf32>
      %c0_39 = arith.constant 0 : index
      %c0_40 = arith.constant 0 : index
      %c0_41 = arith.constant 0 : index
      %65 = vector.load %arg7[%c0_39, %c0_40, %c0_41] : memref<1x32x1xf32, #tpu.memory_space<vmem>>, vector<1x32x1xf32>
      %66 = vector.shape_cast %65 : vector<1x32x1xf32> to vector<32x1xf32>
      %67 = vector.shape_cast %64 : vector<32x1xf32> to vector<1x32x1xf32>
      tpu.vector_store %arg7[%c0_39, %c0_40, %c0_41], %67 {strides = array<i32>} : memref<1x32x1xf32, #tpu.memory_space<vmem>>, vector<1x32x1xf32>,
    } else {
    }
    return
  }
  func.func @transform_0(%arg0: i32, %arg1: i32, %arg2: i32) -> (i32, i32, i32) {
    %c0_i32 = arith.constant 0 : i32
    %c0_i32_0 = arith.constant 0 : i32
    return %arg0, %arg1, %c0_i32 : i32, i32, i32
  }
  func.func @transform_1(%arg0: i32, %arg1: i32, %arg2: i32) -> (i32, i32, i32) {
    %c0_i32 = arith.constant 0 : i32
    %c0_i32_0 = arith.constant 0 : i32
    return %arg0, %arg1, %c0_i32 : i32, i32, i32
  }
  func.func @transform_2(%arg0: i32, %arg1: i32, %arg2: i32) -> (i32, i32, i32) {
    %c0_i32 = arith.constant 0 : i32
    %c0_i32_0 = arith.constant 0 : i32
    return %arg0, %c0_i32, %arg2 : i32, i32, i32
  }
  func.func @transform_3(%arg0: i32, %arg1: i32, %arg2: i32) -> (i32, i32, i32) {
    %c0_i32 = arith.constant 0 : i32
    %c0_i32_0 = arith.constant 0 : i32
    return %arg0, %arg1, %c0_i32 : i32, i32, i32
  }
  func.func @transform_4(%arg0: i32, %arg1: i32, %arg2: i32) -> (i32, i32, i32) {
    %c0_i32 = arith.constant 0 : i32
    %c0_i32_0 = arith.constant 0 : i32
    return %arg0, %arg1, %c0_i32 : i32, i32, i32
  }
}

</mosaic_0001>

<bundles_post_ra>
// kernel: tpu_custom_call.1
= control target key start
LH: loop header
LB: loop body
LE: loop exit
PB: predicated region body
PF: predicated region fallthrough
CT: control target
= control target key end

     0   :  { %10 = vsyncpa [#allocation6], 0  ;;  %s1614_s0 = inlined_call_operand.vmem [shape: s32[2,32,1], index: 0, kind: input, shape index: {}]   ;;  %s1615_s1 = inlined_call_operand.vmem [shape: bf16[2,32,128], index: 1, kind: input, shape index: {}]   ;;  %s1616_s2 = inlined_call_operand.hbm [shape: bf16[2,128,256], index: 2, kind: input, shape index: {}]   ;;  %s1617_s3 = inlined_call_operand.vmem [shape: f32[2,32,1], index: 3, kind: output, shape index: {0}]   ;;  %s1618_s4 = inlined_call_operand.vmem [shape: f32[2,32,1], index: 4, kind: output, shape index: {1}]  }
   0x1   :  { %12 = vsyncpa [#allocation6 + $0x1], 0  ;;  %s1302_s15 = smov 0   ;;  %s1304_s16 = smov 0  }
   0x2   :  { %s1306_s17 = smov 0   ;;  %s1308_s18 = smov 0  }
   0x3   :  { %s1310_s19 = smov 0   ;;  %s1312_s20 = smov 0  }
   0x4 LB: > { %s995_s21 = sadd.s32 4294967295, %s1269_s20   ;;  %s37_s22 = sadd.s32 1, %s1265_s19  ;;  %s1269_s20 = sphi %s1312_s20, %s18_s20   ;;  %s1265_s19 = sphi %s1310_s19, %s1628_s19   ;;  %s1261_s18 = sphi %s1308_s18, %s1627_s18   ;;  %s1257_s17 = sphi %s1306_s17, %s1626_s17   ;;  %s1253_s16 = sphi %s1304_s16, %s1625_s16   ;;  %s1249_s15 = sphi %s1302_s15, %s1624_s15  }
   0x5   : > { %p39_p0 = scmp.ge.s32.totalorder %s37_s22, 2  ;;  %s102_s23 = sadd.s32 1, %s1257_s17 }
   0x6   : > { %p109_p1 = scmp.ne.s32.totalorder %s1257_s17, %s1253_s16  ;;  %p110_p2 = scmp.eq.s32.totalorder %s1269_s20, 0 }
   0x7   : > { %s1630_s22 = smov (%p39_p0, %s37_s22), 0  ;;  %p115_p4 = scmp.ne.s32.totalorder %s1253_s16, %s1249_s15 }
   0x8   : > { %p1338_p3 = por %p110_p2, %p109_p1  ;;  %s97_s25 = ssub.s32 %s1265_s19, %s1630_s22 }
   0x9   : > { %p116_p5 = scmp.eq.s32.totalorder %s995_s21, 0  ;;  %p100_p6 = scmp.eq.s32.totalorder %s97_s25, 0 }
   0xa   : > { %p1059_p8 = scmp.lt.s32.totalorder %s1269_s20, 2  ;;  %s221_s28 = sand.u32 1, %s1257_s17  }
   0xb   : > { %p1345_p7 = por %p116_p5, %p115_p4  ;;  %s1032_s29 = sshll.u32 %s1265_s19, 11 }
   0xc   : > { %s1351_s27 = scalar_select %p100_p6, %s1257_s17, %s102_s23  }
   0xd   : > { %s999_s30 = sshll.u32 %s221_s28, 7  ;;  %s1358_s7 = scalar_lea.hbm %s1616_s2, %s1032_s29 }
   0xe   : > { %s225_s8 = scalar_lea.vmem [#allocation5], %s999_s30  ;;  %p1362_p9 = pnand %p1059_p8, %p1338_p3 }
   0xf   : > { %s234_s9 = sshll.u32 %s225_s8, 4  ;;  %s1368_s11 = scalar_lea.sflag [#allocation6], %s221_s28  ;;  %s1366_s9 = int_to_ptr.vmem [resolvable:$true] %s234_s9 }
  0x10   : > { %s1189_s12 = scalar_lea.hbm %s1358_s7, 2048  ;;  %p1191_p11 = pneg %p1362_p9 }
  0x11   : > { %p1190_p10 = scmp.ne.s32.totalorder %s1358_s7, %s1189_s12  ;;  %s1194_s15 = scalar_lea.hbm %s1616_s2, 4096 }
  0x12   : > { %p1195_p0 = scmp.lt.u32.totalorder %s1358_s7, %s1616_s2  ;;  %p1196_p1 = scmp.lt.u32.totalorder %s1194_s15, %s1189_s12 }
  0x13   : > { %p1192_p12 = pnand %p1191_p11, %p1190_p10  ;;  %p1198_p3 = scmp.lt.u32.totalorder %s1189_s12, %s1358_s7 }
  0x14   : > { %p1197_p2 = por %p1196_p1, %p1195_p0 }
  0x15   : > { %p1193_p13 = pneg %p1192_p12 }
  0x16   : > { %p1199_p4 = por %p1198_p3, %p1197_p2 }
  0x18   : > { %p1200_p5 = pnand %p1199_p4, %p1193_p13 }
  0x1a   : > { %1203 = shalt.err (!%p1200_p5)
}
  0x1b   : > { %s1204_s24 = scalar_lea.vmem %s1366_s9, 2048  ;;  %s1271_s25 = smov [#allocation5]  }
  0x1c   : > { %p1205_p6 = scmp.ne.s32.totalorder %s1366_s9, %s1204_s24  ;;  %s1209_s28 = sshll.u32 %s1271_s25, 4  ;;  %s1210_s28 = int_to_ptr.vmem [resolvable:$false] %s1209_s28 }
  0x1d   : > { %s1211_s29 = scalar_lea.vmem %s1210_s28, 4096  ;;  %p1212_p12 = scmp.lt.s32.totalorder %s1366_s9, %s1210_s28 }
  0x1e   : > { %p1207_p8 = pnand %p1205_p6, %p1191_p11  ;;  %p1213_p0 = scmp.lt.s32.totalorder %s1211_s29, %s1204_s24 }
  0x20   : > { %p1208_p10 = pneg %p1207_p8  ;;  %p1214_p1 = por %p1213_p0, %p1212_p12 }
  0x22   : > { %p1215_p2 = pnand %p1214_p1, %p1208_p10 }
  0x24   : > { %1218 = shalt.err (!%p1215_p2)
}
  0x25   : > { %s1272_s30 = smov 128   ;;  %s1273_s5 = smov 8  }
  0x26   : > { %1058 = dma.hbm_to_vmem [thread:$0]  (!%p1362_p9), %s1358_s7, 2048, %s1366_s9, %s1368_s11, %s1272_s30, %s1272_s30, %s1273_s5  }
  0x27   : > { %p1002_p11 = scmp.ge.s32.totalorder %s1269_s20, 1  ;;  %p242_p13 = scmp.lt.s32.totalorder %s1269_s20, 3 }
  0x29   : > { %p243_p3 = pnand %p1002_p11, %p242_p13 }
  0x2a   : > { %s248_s6 = sand.u32 (!%p243_p3), 1, %s1253_s16  }
  0x2b   : > { %246 = sbr.rel (%p243_p3) target bundleno = 788 (0x314), region = 32  ;;  %s1003_s8 = sshll.u32 (!%p243_p3), %s248_s6, 7 }
  0x2c   : > { %s249_s12 = scalar_lea.sflag (!%p243_p3), [#allocation6], %s248_s6  ;;  %s1399_s13 = scalar_lea.vmem (!%p243_p3), [#allocation5], %s1003_s8 }
  0x32   : > { %1244 = dma.done.wait (%p1345_p7), %s249_s12, 2048  }
  0x33   : > { %1246 = vsyncadd (%p1345_p7), %s249_s12, 4294965248  ;;  %v1274_v0 = vmov 0   ;;  %p309_p9 = scmp.lt.s32.totalorder %s1261_s18, 1  ;;  %v1115_v1 = vld [vmem:[%s1399_s13 + $0x4] ss:$8 sps:$4 sm:$0xff]   ;;  %vm354_vm0 = vcmask 7168   ;;  %v598_v29 = vlaneseq }
  0x34   : > { %511 = vmatprep.mubr.bf16.mxu0 %v1274_v0  ;;  %521 = vmatprep.mubr.bf16.mxu1 %v1274_v0  ;;  %v1117_v2 = vld [vmem:[%s1399_s13] ss:$8 sps:$4 sm:$0xff]   ;;  %v1118_v3 = vld [vmem:[%s1399_s13 + $0x14] ss:$8 sps:$4 sm:$0xff]   ;;  %v1120_v4 = vld [vmem:[%s1399_s13 + $0x10] ss:$8 sps:$4 sm:$0xff]  }
  0x35   : > { %1113 = vset.pattern.permute.xlu0 %v1274_v0  ;;  %1114 = vset.pattern.permute.xlu1 %v1274_v0  ;;  %s1632_s18 = smov (!%p309_p9, %s1261_s18), 1  ;;  %v1121_v5 = vld [vmem:[%s1399_s13 + $0x24] ss:$8 sps:$4 sm:$0xff]   ;;  %v1123_v6 = vld [vmem:[%s1399_s13 + $0x20] ss:$8 sps:$4 sm:$0xff]   ;;  %v1446_v32 = vand.u32 127, %v598_v29 }
  0x36   : > { %479 = vmatprep.subr.bf16.mxu0 %v1115_v1  ;;  %1037 = vmatprep.subr.bf16.mxu1 %v1115_v1  ;;  %s1034_s26 = sshll.u32 %s1632_s18, 4  ;;  %s1412_s7 = sshll.u32 %s1632_s18, 5  ;;  %v1124_v7 = vld [vmem:[%s1399_s13 + $0x34] ss:$8 sps:$4 sm:$0xff]   ;;  %v1126_v8 = vld [vmem:[%s1399_s13 + $0x30] ss:$8 sps:$4 sm:$0xff]  }
  0x37   : > { %480 = vmatpush1.bf16.msra.mxu0 %v1117_v2  ;;  %1045 = vmatpush1.bf16.msra.mxu1 %v1117_v2  ;;  %s1419_s11 = scalar_lea.vmem %s1615_s1, %s1034_s26  ;;  %s316_s21 = scalar_lea.vmem %s1614_s0, %s1412_s7  ;;  %v1127_v9 = vld [vmem:[%s1399_s13 + $0x44] ss:$8 sps:$4 sm:$0xff]   ;;  %v1129_v13 = vld [vmem:[%s1399_s13 + $0x40] ss:$8 sps:$4 sm:$0xff]   ;;  %v1130_v15 = vld [vmem:[%s1399_s13 + $0x54] ss:$8 sps:$4 sm:$0xff]  }
  0x38   : > { %481 = vmatprep.subr.bf16.mxu0 %v1118_v3  ;;  %1038 = vmatprep.subr.bf16.mxu1 %v1118_v3  ;;  %v604_v10 = vld [vmem:[%s316_s21] sm:$0xff]  ;;  %v606_v11 = vld [vmem:[%s316_s21 + $0x10] sm:$0xff]  ;;  %v605_v12 = vld [vmem:[%s316_s21 + $0x8] sm:$0xff]  ;;  %v1275_v27 = vmov -1e+30   ;;  %s347_s24 = scalar_lea.vmem %s1618_s4, %s1412_s7  ;;  %s337_s29 = scalar_lea.vmem %s1617_s3, %s1412_s7 }
  0x39   : > { %609 = vperm.xlu0 %1113, %v604_v10   ;;  %615 = vperm.xlu1 %1114, %v606_v11   ;;  %v607_v14 = vld [vmem:[%s316_s21 + $0x18] sm:$0xff]  ;;  %v628_v16 = vadd.s32 16, %v604_v10  ;;  %v629_v17 = vadd.s32 16, %v605_v12  ;;  %v1133_v19 = vld [vmem:[%s1399_s13 + $0x64] ss:$8 sps:$4 sm:$0xff]   ;;  %v630_v20 = vadd.s32 16, %v606_v11 }
  0x3a   : > { %v1132_v18 = vld [vmem:[%s1399_s13 + $0x50] ss:$8 sps:$4 sm:$0xff]   ;;  %v631_v21 = vadd.s32 16, %v607_v14  ;;  %v1135_v22 = vld [vmem:[%s1399_s13 + $0x60] ss:$8 sps:$4 sm:$0xff]   ;;  %355 = vst.msk [vmem:[#allocation2] sm:$0xff] %vm354_vm0, %v1275_v27 }
  0x3b   : > { %482 = vmatpush1.bf16.msra.mxu0 %v1120_v4  ;;  %1046 = vmatpush1.bf16.msra.mxu1 %v1120_v4  ;;  %v1136_v23 = vld [vmem:[%s1399_s13 + $0x74] ss:$8 sps:$4 sm:$0xff]   ;;  %v1138_v24 = vld [vmem:[%s1399_s13 + $0x70] ss:$8 sps:$4 sm:$0xff]   ;;  %v1139_v25 = vld [vmem:[%s1419_s11] sm:$0xff]   ;;  %356 = vst.msk [vmem:[#allocation2 + $0x8] sm:$0xff] %vm354_vm0, %v1275_v27 }
  0x3c   : > { %483 = vmatprep.subr.bf16.mxu0 %v1121_v5  ;;  %1039 = vmatprep.subr.bf16.mxu1 %v1121_v5  ;;  %v1140_v26 = vld [vmem:[%s1419_s11 + $0x8] sm:$0xff]   ;;  %357 = vst.msk [vmem:[#allocation2 + $0x10] sm:$0xff] %vm354_vm0, %v1275_v27  ;;  %358 = vst.msk [vmem:[#allocation2 + $0x18] sm:$0xff] %vm354_vm0, %v1275_v27 }
  0x3d   : > { %612 = vperm.xlu0 %1113, %v605_v12   ;;  %618 = vperm.xlu1 %1114, %v607_v14  }
  0x3f   : > { %484 = vmatpush1.bf16.msra.mxu0 %v1123_v6  ;;  %1047 = vmatpush1.bf16.msra.mxu1 %v1123_v6  ;;  %v600_v6 = vadd.s32 128, %v1446_v32 }
  0x40   : > { %485 = vmatprep.subr.bf16.mxu0 %v1124_v7  ;;  %1040 = vmatprep.subr.bf16.mxu1 %v1124_v7 }
  0x41   : > { %633 = vperm.xlu0 %1113, %v628_v16   ;;  %636 = vperm.xlu1 %1114, %v629_v17  }
  0x43   : > { %486 = vmatpush1.bf16.msra.mxu0 %v1126_v8  ;;  %1048 = vmatpush1.bf16.msra.mxu1 %v1126_v8 }
  0x44   : > { %487 = vmatprep.subr.bf16.mxu0 %v1127_v9  ;;  %1041 = vmatprep.subr.bf16.mxu1 %v1127_v9 }
  0x45   : > { %639 = vperm.xlu0 %1113, %v630_v20   ;;  %642 = vperm.xlu1 %1114, %v631_v21  }
  0x47   : > { %488 = vmatpush1.bf16.msra.mxu0 %v1129_v13  ;;  %1049 = vmatpush1.bf16.msra.mxu1 %v1129_v13 }
  0x48   : > { %489 = vmatprep.subr.bf16.mxu0 %v1130_v15  ;;  %1042 = vmatprep.subr.bf16.mxu1 %v1130_v15 }
  0x4b   : > { %490 = vmatpush1.bf16.msra.mxu0 %v1132_v18  ;;  %1050 = vmatpush1.bf16.msra.mxu1 %v1132_v18 }
  0x4c   : > { %491 = vmatprep.subr.bf16.mxu0 %v1133_v19  ;;  %1043 = vmatprep.subr.bf16.mxu1 %v1133_v19 }
  0x4f   : > { %492 = vmatpush1.bf16.msra.mxu0 %v1135_v22  ;;  %1051 = vmatpush1.bf16.msra.mxu1 %v1135_v22 }
  0x50   : > { %493 = vmatprep.subr.bf16.mxu0 %v1136_v23  ;;  %1044 = vmatprep.subr.bf16.mxu1 %v1136_v23 }
  0x53   : > { %494 = vmatpush1.bf16.msra.mxu0 %v1138_v24  ;;  %1052 = vmatpush1.bf16.msra.mxu1 %v1138_v24 }
  0x56   : > { %512 = vmatmul.mubr.bf16.vlgmr.msra.gmra.mrb[0].mxu0 %v1139_v25  ;;  %522 = vmatmul.mubr.bf16.vlgmr.msra.gmra.mrb[0].mxu1 %v1140_v26 }
  0xb8   : > { %v1440_v28 = vpop.permute.xlu0 %609  ;;  %v1442_v30 = vpop.permute.xlu1 %615 }
  0xb9   : > { %vm620_vm1 = vcmp.ge.s32.totalorder %v1446_v32, %v1440_v28  ;;  %vm621_vm3 = vcmp.ge.s32.totalorder %v600_v6, %v1440_v28  ;;  %vm624_vm7 = vcmp.ge.s32.totalorder %v1446_v32, %v1442_v30  ;;  %vm625_vm10 = vcmp.ge.s32.totalorder %v600_v6, %v1442_v30 }
  0xbc   : > { %v1444_v31 = vpop.permute.xlu0 %612  ;;  %v1448_v57 = vpop.permute.xlu1 %618 }
  0xbd   : > { %vm622_vm5 = vcmp.ge.s32.totalorder %v1446_v32, %v1444_v31  ;;  %vm623_vm13 = vcmp.ge.s32.totalorder %v600_v6, %v1444_v31  ;;  %vm626_vm14 = vcmp.ge.s32.totalorder %v1446_v32, %v1448_v57 }
  0xc0   : > { %v634_v2 = vpop.permute.xlu0 %633  ;;  %v637_v8 = vpop.permute.xlu1 %636 }
  0xc1   : > { %vm644_vm2 = vcmp.lt.s32.totalorder %v1446_v32, %v634_v2  ;;  %vm645_vm4 = vcmp.lt.s32.totalorder %v600_v6, %v634_v2  ;;  %vm646_vm6 = vcmp.lt.s32.totalorder %v1446_v32, %v637_v8 }
  0xc2   : > { %vm652_vm8 = vmand %vm620_vm1, %vm644_vm2  ;;  %vm627_vm1 = vcmp.ge.s32.totalorder %v600_v6, %v1448_v57  ;;  %vm647_vm2 = vcmp.lt.s32.totalorder %v600_v6, %v637_v8 }
  0xc3   : > { %vm653_vm11 = vmand %vm621_vm3, %vm645_vm4 }
  0xc4   : > { %v640_v9 = vpop.permute.xlu0 %639  ;;  %v643_v16 = vpop.permute.xlu1 %642  ;;  %vm1480_vm15 = vmand %vm622_vm5, %vm646_vm6 }
  0xc5   : > { %vm648_vm9 = vcmp.lt.s32.totalorder %v1446_v32, %v640_v9  ;;  %vm649_vm12 = vcmp.lt.s32.totalorder %v600_v6, %v640_v9  ;;  %vm650_vm5 = vcmp.lt.s32.totalorder %v1446_v32, %v643_v16  ;;  %vm651_vm6 = vcmp.lt.s32.totalorder %v600_v6, %v643_v16  ;;  %v1525_v32 = vld [vmem:[#allocation2] sm:$0xff] }
  0xc6   : > { %vm656_vm3 = vmand %vm624_vm7, %vm648_vm9 }
  0xc7   : > { %vm657_vm4 = vmand %vm625_vm10, %vm649_vm12 }
  0xc8   : > { %vm655_vm7 = vmand %vm623_vm13, %vm647_vm2 }
  0xc9   : > { %vm659_vm9 = vmand %vm627_vm1, %vm651_vm6 }
 0x129   : > { %v513_v33 = vpop.f32.mrb[0].mxu0  ;;  %v523_v34 = vpop.f32.mrb[0].mxu1 }
 0x12a   : > { %v532_v35 = vmul.f32 0.088388346, %v513_v33  ;;  %v536_v36 = vmul.f32 0.088388346, %v523_v34  ;;  %v515_v37 = vpop.f32.mrb[1].mxu0  ;;  %v525_v38 = vpop.f32.mrb[1].mxu1 }
 0x12b   : > { %v533_v39 = vmul.f32 0.088388346, %v515_v37  ;;  %v537_v40 = vmul.f32 0.088388346, %v525_v38  ;;  %v517_v41 = vpop.f32.mrb[2].mxu0  ;;  %v527_v42 = vpop.f32.mrb[2].mxu1 }
 0x12c   : > { %v544_v43 = vmul.f32 %v532_v35, %v532_v35  ;;  %v573_v44 = vmul.f32 0.05, %v532_v35  ;;  %v548_v45 = vmul.f32 %v536_v36, %v536_v36  ;;  %v577_v46 = vmul.f32 0.05, %v536_v36  ;;  %v519_v47 = vpop.f32.mrb[3].mxu0  ;;  %v529_v48 = vpop.f32.mrb[3].mxu1 }
 0x12d   : > { %v545_v49 = vmul.f32 %v533_v39, %v533_v39  ;;  %v574_v50 = vmul.f32 0.05, %v533_v39  ;;  %v549_v51 = vmul.f32 %v537_v40, %v537_v40  ;;  %v578_v52 = vmul.f32 0.05, %v537_v40 }
 0x12e   : > { %1141 = vtanh.f32 %v573_v44  ;;  %v534_v53 = vmul.f32 0.088388346, %v517_v41  ;;  %v538_v54 = vmul.f32 0.088388346, %v527_v42  ;;  %v535_v55 = vmul.f32 0.088388346, %v519_v47 }
 0x12f   : > { %1143 = vtanh.f32 %v577_v46  ;;  %v539_v56 = vmul.f32 0.088388346, %v529_v48  ;;  %v1450_v58 = vadd.f32 %v545_v49, %v544_v43  ;;  %v1452_v59 = vadd.f32 %v549_v51, %v548_v45  ;;  %v1530_v44 = vld [vmem:[#allocation2 + $0x8] sm:$0xff]  ;;  %v1532_v45 = vld [vmem:[#allocation2 + $0x10] sm:$0xff]  ;;  %v1545_v51 = vld [vmem:[#allocation2 + $0x18] sm:$0xff] }
 0x130   : > { %1145 = vtanh.f32 %v574_v50  ;;  %v546_v60 = vmul.f32 %v534_v53, %v534_v53  ;;  %v575_v61 = vmul.f32 0.05, %v534_v53  ;;  %v550_v62 = vmul.f32 %v538_v54, %v538_v54 }
 0x131   : > { %1147 = vtanh.f32 %v578_v52  ;;  %v579_v63 = vmul.f32 0.05, %v538_v54  ;;  %v547_v0 = vmul.f32 %v535_v55, %v535_v55  ;;  %v576_v1 = vmul.f32 0.05, %v535_v55 }
 0x132   : > { %1149 = vtanh.f32 %v575_v61  ;;  %v551_v3 = vmul.f32 %v539_v56, %v539_v56  ;;  %v580_v4 = vmul.f32 0.05, %v539_v56  ;;  %v1276_v41 = vmov 0.0  }
 0x133   : > { %1151 = vtanh.f32 %v579_v63  ;;  %v1454_v5 = vadd.f32 %v547_v0, %v546_v60  ;;  %359 = vst.msk [vmem:[#allocation3] sm:$0xff] %vm354_vm0, %v1276_v41  ;;  %360 = vst.msk [vmem:[#allocation3 + $0x8] sm:$0xff] %vm354_vm0, %v1276_v41 }
 0x134   : > { %1153 = vtanh.f32 %v576_v1  ;;  %v1457_v7 = vadd.f32 %v551_v3, %v550_v62  ;;  %361 = vst.msk [vmem:[#allocation3 + $0x10] sm:$0xff] %vm354_vm0, %v1276_v41  ;;  %362 = vst.msk [vmem:[#allocation3 + $0x18] sm:$0xff] %vm354_vm0, %v1276_v41 }
 0x135   : > { %1155 = vtanh.f32 %v580_v4  ;;  %363 = vst.msk [vmem:[#allocation4] sm:$0xff] %vm354_vm0, %v1276_v41  ;;  %364 = vst.msk [vmem:[#allocation4 + $0x8] sm:$0xff] %vm354_vm0, %v1276_v41 }
 0x136   : > { %365 = vst.msk [vmem:[#allocation4 + $0x10] sm:$0xff] %vm354_vm0, %v1276_v41  ;;  %366 = vst.msk [vmem:[#allocation4 + $0x18] sm:$0xff] %vm354_vm0, %v1276_v41 }
 0x138   : > { %v1142_v10 = vpop.eup %1141 }
 0x139   : > { %v1144_v11 = vpop.eup %1143  ;;  %v589_v12 = vmul.f32 20.0, %v1142_v10 }
 0x13a   : > { %v1146_v13 = vpop.eup %1145  ;;  %v593_v14 = vmul.f32 20.0, %v1144_v11 }
 0x13b   : > { %v1148_v15 = vpop.eup %1147  ;;  %v590_v17 = vmul.f32 20.0, %v1146_v13  ;;  %v1470_v18 = vsel %vm652_vm8, -1e+09, %v589_v12  ;;  %vm658_vm8 = vmand %vm626_vm14, %vm650_vm5 }
 0x13c   : > { %v1150_v19 = vpop.eup %1149  ;;  %v594_v21 = vmul.f32 20.0, %v1148_v15  ;;  %v1498_v27 = vsel %vm656_vm3, -1e+09, %v593_v14 }
 0x13d   : > { %v1152_v22 = vpop.eup %1151  ;;  %v1490_v23 = vsel %vm653_vm11, -1e+09, %v590_v17  ;;  %v591_v24 = vmul.f32 20.0, %v1150_v19 }
 0x13e   : > { %v1154_v25 = vpop.eup %1153  ;;  %v672_v26 = vmax.f32 %v1470_v18, %v1490_v23  ;;  %v1504_v34 = vsel %vm657_vm4, -1e+09, %v594_v21  ;;  %v595_v35 = vmul.f32 20.0, %v1152_v22 }
 0x13f   : > { %v1156_v28 = vpop.eup %1155  ;;  %v592_v29 = vmul.f32 20.0, %v1154_v25  ;;  %v1502_v33 = vsel %vm1480_vm15, -1e+09, %v591_v24  ;;  %v678_v38 = vmax.f32 %v1498_v27, %v1504_v34 }
 0x140   : > { %673 = vmax.xlane.f32.xlu0 %v672_v26  ;;  %v596_v30 = vmul.f32 20.0, %v1156_v28  ;;  %v666_v39 = vsel %vm658_vm8, -1e+09, %v595_v35 }
 0x141   : > { %v663_v36 = vsel %vm655_vm7, -1e+09, %v592_v29 }
 0x142   : > { %v675_v37 = vmax.f32 %v1502_v33, %v663_v36  ;;  %v667_v40 = vsel %vm659_vm9, -1e+09, %v596_v30 }
 0x143   : > { %v681_v31 = vmax.f32 %v666_v39, %v667_v40 }
 0x144   : > { %676 = vmax.xlane.f32.xlu1 %v675_v37  ;;  %679 = vmax.xlane.f32.xlu0 %v678_v38  ;;  %v701_v38 = vld [vmem:[#allocation3 + $0x8] sm:$0xff] }
 0x148   : > { %682 = vmax.xlane.f32.xlu0 %v681_v31 }
 0x1cd   : > { %v674_v42 = vpop.xlane.xlu0 %673 }
 0x1ce   : > { %v1528_v43 = vmax.f32 %v1525_v32, %v674_v42 }
 0x1d0   : > { %v688_v46 = vsub.f32 %v1525_v32, %v1528_v43  ;;  %772 = vst.msk [vmem:[#allocation2] sm:$0xff] %vm354_vm0, %v1528_v43  ;;  %710 = vperm.xlu1 %1114, %v1528_v43  }
 0x1d1   : > { %v677_v47 = vpop.xlane.xlu1 %676  ;;  %v680_v48 = vpop.xlane.xlu0 %679 }
 0x1d2   : > { %v1540_v49 = vmax.f32 %v1530_v44, %v677_v47  ;;  %v1543_v50 = vmax.f32 %v1532_v45, %v680_v48  ;;  %v692_v29 = vmul.f32 1.442695, %v688_v46 }
 0x1d4   : > { %v689_v52 = vsub.f32 %v1530_v44, %v1540_v49  ;;  %773 = vst.msk [vmem:[#allocation2 + $0x8] sm:$0xff] %vm354_vm0, %v1540_v49  ;;  %v690_v53 = vsub.f32 %v1532_v45, %v1543_v50  ;;  %774 = vst.msk [vmem:[#allocation2 + $0x10] sm:$0xff] %vm354_vm0, %v1543_v50  ;;  %715 = vperm.xlu0 %1113, %v1540_v49   ;;  %720 = vperm.xlu1 %1114, %v1543_v50   ;;  %v540_v44 = vld [vmem:[#allocation4] sm:$0xff]  ;;  %v703_v45 = vld [vmem:[#allocation3 + $0x18] sm:$0xff] }
 0x1d5   : > { %v683_v54 = vpop.xlane.xlu0 %682 }
 0x1d6   : > { %v687_v55 = vmax.f32 %v1545_v51, %v683_v54 }
 0x1d8   : > { %v691_v56 = vsub.f32 %v1545_v51, %v687_v55  ;;  %775 = vst.msk [vmem:[#allocation2 + $0x18] sm:$0xff] %vm354_vm0, %v687_v55  ;;  %725 = vperm.xlu1 %1114, %v687_v55   ;;  %v541_v55 = vld [vmem:[#allocation4 + $0x8] sm:$0xff] }
 0x1da   : > { %v698_v35 = vmul.f32 1.442695, %v691_v56 }
 0x24f   : > { %v711_v57 = vpop.permute.xlu1 %710 }
 0x250   : > { %v728_v60 = vsub.f32 %v1470_v18, %v711_v57  ;;  %v729_v61 = vsub.f32 %v1490_v23, %v711_v57 }
 0x252   : > { %v736_v62 = vmul.f32 1.442695, %v728_v60  ;;  %v738_v63 = vmul.f32 1.442695, %v729_v61 }
 0x253   : > { %v716_v0 = vpop.permute.xlu0 %715  ;;  %v721_v1 = vpop.permute.xlu1 %720 }
 0x254   : > { %1157 = vpow2.f32 %v736_v62  ;;  %v730_v2 = vsub.f32 %v1502_v33, %v716_v0  ;;  %v731_v3 = vsub.f32 %v663_v36, %v716_v0  ;;  %v732_v4 = vsub.f32 %v1498_v27, %v721_v1 }
 0x255   : > { %1159 = vpow2.f32 %v738_v63  ;;  %v733_v6 = vsub.f32 %v1504_v34, %v721_v1  ;;  %v694_v33 = vmul.f32 1.442695, %v689_v52  ;;  %v696_v34 = vmul.f32 1.442695, %v690_v53  ;;  %v542_v52 = vld [vmem:[#allocation4 + $0x10] sm:$0xff]  ;;  %v543_v63 = vld [vmem:[#allocation4 + $0x18] sm:$0xff] }
 0x256   : > { %v740_v8 = vmul.f32 1.442695, %v730_v2  ;;  %v742_v9 = vmul.f32 1.442695, %v731_v3  ;;  %v744_v10 = vmul.f32 1.442695, %v732_v4 }
 0x257   : > { %v746_v11 = vmul.f32 1.442695, %v733_v6  ;;  %v726_v12 = vpop.permute.xlu1 %725 }
 0x258   : > { %1161 = vpow2.f32 %v740_v8  ;;  %v734_v13 = vsub.f32 %v666_v39, %v726_v12  ;;  %v735_v14 = vsub.f32 %v667_v40, %v726_v12 }
 0x259   : > { %1163 = vpow2.f32 %v742_v9  ;;  %v779_v9 = vld [vmem:[#allocation2] sm:$0xff] }
 0x25a   : > { %1165 = vpow2.f32 %v744_v10  ;;  %v748_v15 = vmul.f32 1.442695, %v734_v13  ;;  %v750_v16 = vmul.f32 1.442695, %v735_v14 }
 0x25b   : > { %1167 = vpow2.f32 %v746_v11 }
 0x25c   : > { %1169 = vpow2.f32 %v748_v15  ;;  %v780_v15 = vld [vmem:[#allocation2 + $0x8] sm:$0xff] }
 0x25d   : > { %1171 = vpow2.f32 %v750_v16 }
 0x25e   : > { %v1158_v17 = vpop.eup %1157  ;;  %1173 = vpow2.f32 %v692_v29 }
 0x25f   : > { %v1160_v18 = vpop.eup %1159  ;;  %1175 = vpow2.f32 %v694_v33 }
 0x260   : > { %v752_v19 = vadd.f32 %v1160_v18, %v1158_v17  ;;  %1177 = vpow2.f32 %v696_v34 }
 0x261   : > { %1179 = vpow2.f32 %v698_v35 }
 0x262   : > { %v1162_v20 = vpop.eup %1161  ;;  %753 = vadd.xlane.f32.xlu0 %v752_v19  ;;  %v781_v19 = vld [vmem:[#allocation2 + $0x10] sm:$0xff] }
 0x263   : > { %v1164_v21 = vpop.eup %1163 }
 0x264   : > { %v1166_v22 = vpop.eup %1165  ;;  %v755_v23 = vadd.f32 %v1164_v21, %v1162_v20 }
 0x265   : > { %v1168_v24 = vpop.eup %1167 }
 0x266   : > { %v1170_v25 = vpop.eup %1169  ;;  %756 = vadd.xlane.f32.xlu1 %v755_v23  ;;  %v758_v26 = vadd.f32 %v1168_v24, %v1166_v22  ;;  %v782_v23 = vld [vmem:[#allocation2 + $0x18] sm:$0xff] }
 0x267   : > { %v1172_v27 = vpop.eup %1171 }
 0x268   : > { %759 = vadd.xlane.f32.xlu0 %v758_v26  ;;  %v761_v28 = vadd.f32 %v1172_v27, %v1170_v25  ;;  %v1174_v30 = vpop.eup %1173 }
 0x269   : > { %v1176_v37 = vpop.eup %1175 }
 0x26a   : > { %553 = vadd.xlane.f32.xlu1 %v1450_v58  ;;  %v700_v58 = vld [vmem:[#allocation3] sm:$0xff]  ;;  %v1178_v39 = vpop.eup %1177  ;;  %v705_v40 = vmul.f32 %v1176_v37, %v701_v38 }
 0x26b   : > { %v704_v36 = vmul.f32 %v1174_v30, %v700_v58  ;;  %v1180_v42 = vpop.eup %1179 }
 0x26c   : > { %762 = vadd.xlane.f32.xlu0 %v761_v28  ;;  %v707_v49 = vmul.f32 %v1180_v42, %v703_v45 }
 0x26e   : > { %559 = vadd.xlane.f32.xlu1 %v1452_v59 }
 0x270   : > { %556 = vadd.xlane.f32.xlu0 %v1454_v5 }
 0x274   : > { %562 = vadd.xlane.f32.xlu0 %v1457_v7  ;;  %v702_v7 = vld [vmem:[#allocation3 + $0x10] sm:$0xff] }
 0x275   : > { %v706_v32 = vmul.f32 %v1178_v39, %v702_v7 }
 0x2ef   : > { %v754_v59 = vpop.xlane.xlu0 %753 }
 0x2f0   : > { %v764_v5 = vadd.f32 %v754_v59, %v704_v36 }
 0x2f2   : > { %768 = vst.msk [vmem:[#allocation3] sm:$0xff] %vm354_vm0, %v764_v5 }
 0x2f3   : > { %v757_v31 = vpop.xlane.xlu1 %756 }
 0x2f4   : > { %v765_v41 = vadd.f32 %v757_v31, %v705_v40 }
 0x2f5   : > { %v760_v43 = vpop.xlane.xlu0 %759 }
 0x2f6   : > { %769 = vst.msk [vmem:[#allocation3 + $0x8] sm:$0xff] %vm354_vm0, %v765_v41  ;;  %v766_v46 = vadd.f32 %v760_v43, %v706_v32 }
 0x2f7   : > { %v554_v47 = vpop.xlane.xlu1 %553 }
 0x2f8   : > { %770 = vst.msk [vmem:[#allocation3 + $0x10] sm:$0xff] %vm354_vm0, %v766_v46  ;;  %v564_v48 = vadd.f32 %v554_v47, %v540_v44 }
 0x2f9   : > { %v783_v50 = vld [vmem:[#allocation3] sm:$0xff]  ;;  %v763_v51 = vpop.xlane.xlu0 %762 }
 0x2fa   : > { %1181 = vlog2.f32 %v783_v50  ;;  %569 = vst.msk [vmem:[#allocation4] sm:$0xff] %vm354_vm0, %v564_v48  ;;  %v767_v53 = vadd.f32 %v763_v51, %v707_v49 }
 0x2fb   : > { %v560_v54 = vpop.xlane.xlu1 %559 }
 0x2fc   : > { %771 = vst.msk [vmem:[#allocation3 + $0x18] sm:$0xff] %vm354_vm0, %v767_v53  ;;  %v566_v56 = vadd.f32 %v560_v54, %v542_v52 }
 0x2fd   : > { %v784_v57 = vld [vmem:[#allocation3 + $0x8] sm:$0xff]  ;;  %v557_v60 = vpop.xlane.xlu0 %556 }
 0x2fe   : > { %1183 = vlog2.f32 %v784_v57  ;;  %571 = vst.msk [vmem:[#allocation4 + $0x10] sm:$0xff] %vm354_vm0, %v566_v56  ;;  %v565_v61 = vadd.f32 %v557_v60, %v541_v55 }
 0x2ff   : > { %v785_v62 = vld [vmem:[#allocation3 + $0x10] sm:$0xff] }
 0x300   : > { %1185 = vlog2.f32 %v785_v62  ;;  %570 = vst.msk [vmem:[#allocation4 + $0x8] sm:$0xff] %vm354_vm0, %v565_v61 }
 0x301   : > { %v803_v0 = vld [vmem:[#allocation4] sm:$0xff]  ;;  %v563_v1 = vpop.xlane.xlu0 %562 }
 0x302   : > { %807 = vst.msk [vmem:[%s347_s24] sm:$0xff] %vm354_vm0, %v803_v0  ;;  %v567_v2 = vadd.f32 %v563_v1, %v543_v63 }
 0x303   : > { %v786_v3 = vld [vmem:[#allocation3 + $0x18] sm:$0xff] }
 0x304   : > { %v1182_v4 = vpop.eup %1181  ;;  %1187 = vlog2.f32 %v786_v3  ;;  %572 = vst.msk [vmem:[#allocation4 + $0x18] sm:$0xff] %vm354_vm0, %v567_v2 }
 0x305   : > { %v788_v6 = vmul.f32 0.6931472, %v1182_v4  ;;  %v805_v8 = vld [vmem:[#allocation4 + $0x10] sm:$0xff] }
 0x306   : > { %809 = vst.msk [vmem:[%s347_s24 + $0x10] sm:$0xff] %vm354_vm0, %v805_v8 }
 0x307   : > { %v795_v10 = vadd.f32 %v788_v6, %v779_v9  ;;  %v804_v11 = vld [vmem:[#allocation4 + $0x8] sm:$0xff] }
 0x308   : > { %v1184_v12 = vpop.eup %1183  ;;  %808 = vst.msk [vmem:[%s347_s24 + $0x8] sm:$0xff] %vm354_vm0, %v804_v11 }
 0x309   : > { %799 = vst.msk [vmem:[%s337_s29] sm:$0xff] %vm354_vm0, %v795_v10  ;;  %v790_v13 = vmul.f32 0.6931472, %v1184_v12 }
 0x30a   : > { %v1186_v14 = vpop.eup %1185 }
 0x30b   : > { %v796_v16 = vadd.f32 %v790_v13, %v780_v15  ;;  %v792_v17 = vmul.f32 0.6931472, %v1186_v14  ;;  %v806_v18 = vld [vmem:[#allocation4 + $0x18] sm:$0xff] }
 0x30c   : > { %810 = vst.msk [vmem:[%s347_s24 + $0x18] sm:$0xff] %vm354_vm0, %v806_v18 }
 0x30d   : > { %800 = vst.msk [vmem:[%s337_s29 + $0x8] sm:$0xff] %vm354_vm0, %v796_v16  ;;  %v797_v20 = vadd.f32 %v792_v17, %v781_v19 }
 0x30e   : > { %v1188_v21 = vpop.eup %1187 }
 0x30f   : > { %801 = vst.msk [vmem:[%s337_s29 + $0x10] sm:$0xff] %vm354_vm0, %v797_v20  ;;  %v794_v22 = vmul.f32 0.6931472, %v1188_v21 }
 0x311   : > { %v798_v24 = vadd.f32 %v794_v22, %v782_v23 }
 0x313   : > { %802 = vst.msk [vmem:[%s337_s29 + $0x18] sm:$0xff] %vm354_vm0, %v798_v24 }
 0x314 PF: > { %s18_s20 = sadd.s32 1, %s1269_s20   ;;  %s1624_s15 = smov %s1253_s16 }
 0x315   : > { %p15_p7 = scmp.ge.s32.totalorder %s18_s20, 4   ;;  %s1625_s16 = smov %s1257_s17 }
 0x316   : > { %s1626_s17 = smov %s1351_s27  ;;  %s1627_s18 = smov %s1265_s19 }
 0x317   : > { %s1628_s19 = smov %s1630_s22  ;;  %17 = sbr.rel (!%p15_p7) target bundleno = 4 (0x4), region = 98 }
 0x31e   :  { %866 = vsyncpa [#allocation6], 1 }
 0x31f   :  { %868 = vsyncpa [#allocation6 + $0x1], 1 }

</bundles_post_ra>
